<compile_context>
chip_gen: v5e
topology: v5e:2x2
jax: 0.10.0
libtpu: 0.0.40
codegen_flags: <defaults>
</compile_context>

<pallas_src>
import functools
import math

import jax
import jax.numpy as jnp
from jax import lax
from jax.experimental import pallas as pl
from jax.experimental.pallas import tpu as pltpu

_PAD_NEG = -1e30  # additive bias for padded keys (avoids inf-inf NaNs)
_gelu = functools.partial(jax.nn.gelu, approximate=True)


# --------------------------------------------------------------------------- #
# Tiling helpers                                                              #
# --------------------------------------------------------------------------- #
def _row_tile(m, target=512):
    """Largest row tile <= target that divides m and respects the (8,·) rule."""
    if m <= target:
        return m
    t = (target // 8) * 8
    while t >= 8:
        if m % t == 0:
            return t
        t -= 8
    return m


def _frame_tile(t, b, d, itemsize=4, budget_bytes=2 * 1024 * 1024):
    """Frame tile for (B, tile, D) blocks: divides T, multiple of 8 (or == T)."""
    max_rows = max(1, budget_bytes // max(1, b * d * itemsize))
    if max_rows >= t:
        return t
    tile = (max_rows // 8) * 8
    while tile >= 8:
        if t % tile == 0:
            return tile
        tile -= 8
    return t


# --------------------------------------------------------------------------- #
# Kernel bodies                                                               #
# --------------------------------------------------------------------------- #
def _skel_pe_kernel(x_ref, w_ref, b_ref, pe_ref, o_ref):
    # x: (1, T, K), w: (K, D), b: (1, D), pe: (1, T, D)
    h = jnp.dot(x_ref[0], w_ref[...], preferred_element_type=jnp.float32)
    h = h + b_ref[...] + pe_ref[0]
    o_ref[0] = h.astype(o_ref.dtype)


def _linear_kernel(x_ref, w_ref, b_ref, o_ref, *, activation):
    acc = jnp.dot(x_ref[...], w_ref[...], preferred_element_type=jnp.float32)
    acc = acc + b_ref[...]                      # (1, N) broadcasts over rows
    if activation == "gelu":
        acc = _gelu(acc)
    o_ref[...] = acc.astype(o_ref.dtype)


def _linear_add_ln_kernel(x_ref, w_ref, b_ref, r_ref, g_ref, bt_ref, o_ref, *, eps):
    # LayerNorm(residual + x @ w + b), fused.
    y = jnp.dot(x_ref[...], w_ref[...], preferred_element_type=jnp.float32)
    h = r_ref[...].astype(jnp.float32) + y + b_ref[...]
    mean = jnp.mean(h, axis=-1, keepdims=True)
    var = jnp.mean(jnp.square(h - mean), axis=-1, keepdims=True)
    hn = (h - mean) * lax.rsqrt(var + eps)
    o_ref[...] = (hn * g_ref[...] + bt_ref[...]).astype(o_ref.dtype)


def _attn_kernel(qkv_ref, bias_ref, o_ref, *, num_heads, scale):
    # qkv: (1, T, 3D) packed [q | k | v]; bias: (1, 1, T) key-padding bias.
    qkv = qkv_ref[0]                             # (T, 3D)
    bias = bias_ref[0]                           # (1, T)
    d_model = qkv.shape[-1] // 3
    hd = d_model // num_heads
    heads = []
    for h in range(num_heads):                   # static unroll over heads
        lo = h * hd
        q = qkv[:, lo:lo + hd]                               # (T, hd)
        k = qkv[:, d_model + lo:d_model + lo + hd]           # (T, hd)
        v = qkv[:, 2 * d_model + lo:2 * d_model + lo + hd]   # (T, hd)
        s = lax.dot_general(q, k, (((1,), (1,)), ((), ())),
                            preferred_element_type=jnp.float32) * scale
        s = s + bias                                          # broadcast over queries
        m = jnp.max(s, axis=-1, keepdims=True)
        e = jnp.exp(s - m)
        p = e / jnp.sum(e, axis=-1, keepdims=True)
        heads.append(jnp.dot(p.astype(v.dtype), v,
                             preferred_element_type=jnp.float32))
    o_ref[0] = jnp.concatenate(heads, axis=-1).astype(o_ref.dtype)


def _mean_heads_kernel(x_ref, wm_ref, bm_ref, ws_ref, bs_ref,
                       mu_ref, lv_ref, acc_ref, *, inv_t):
    @pl.when(pl.program_id(0) == 0)
    def _():
        acc_ref[...] = jnp.zeros_like(acc_ref)

    acc_ref[...] += jnp.sum(x_ref[...].astype(jnp.float32), axis=1)

    @pl.when(pl.program_id(0) == pl.num_programs(0) - 1)
    def _():
        z = acc_ref[...] * inv_t
        mu_ref[...] = (jnp.dot(z, wm_ref[...], preferred_element_type=jnp.float32)
                       + bm_ref[...]).astype(mu_ref.dtype)
        lv_ref[...] = (jnp.dot(z, ws_ref[...], preferred_element_type=jnp.float32)
                       + bs_ref[...]).astype(lv_ref.dtype)


# --------------------------------------------------------------------------- #
# Pallas wrappers                                                             #
# --------------------------------------------------------------------------- #
def skel_embed_pe(x, w, b, pe):
    """x: [B, T, K]; pe: [1, T, D]. Returns LayerNorm-free  x@w+b+pe  [B, T, D]."""
    B, T, K = x.shape
    D = w.shape[1]
    return pl.pallas_call(
        _skel_pe_kernel,
        out_shape=jax.ShapeDtypeStruct((B, T, D), x.dtype),
        grid=(B,),
        in_specs=[
            pl.BlockSpec((1, T, K), lambda bi: (bi, 0, 0)),
            pl.BlockSpec((K, D), lambda bi: (0, 0)),     # weight stays resident
            pl.BlockSpec((1, D), lambda bi: (0, 0)),
            pl.BlockSpec((1, T, D), lambda bi: (0, 0, 0)),
        ],
        out_specs=pl.BlockSpec((1, T, D), lambda bi: (bi, 0, 0)),
        compiler_params=pltpu.CompilerParams(dimension_semantics=("parallel",)),
    )(x, w, b.reshape(1, D), pe)


def linear(x, w, b, activation=None, row_tile=512):
    """y = x @ w + b (optionally fused GELU). x: [M, K], w: [K, N], b: [N]."""
    M, K = x.shape
    N = w.shape[1]
    tm = _row_tile(M, row_tile)
    kernel = functools.partial(_linear_kernel, activation=activation)
    return pl.pallas_call(
        kernel,
        out_shape=jax.ShapeDtypeStruct((M, N), x.dtype),
        grid=(M // tm,),
        in_specs=[
            pl.BlockSpec((tm, K), lambda i: (i, 0)),
            pl.BlockSpec((K, N), lambda i: (0, 0)),      # weight stays resident
            pl.BlockSpec((1, N), lambda i: (0, 0)),      # bias stays resident
        ],
        out_specs=pl.BlockSpec((tm, N), lambda i: (i, 0)),
        compiler_params=pltpu.CompilerParams(dimension_semantics=("parallel",)),
    )(x, w, b.reshape(1, N))


def linear_add_ln(x, w, b, residual, gamma, beta, eps=1e-5, row_tile=512):
    """LayerNorm(residual + x @ w + b). x: [M, K], residual: [M, N]."""
    M, K = x.shape
    N = w.shape[1]
    tm = _row_tile(M, row_tile)
    kernel = functools.partial(_linear_add_ln_kernel, eps=eps)
    return pl.pallas_call(
        kernel,
        out_shape=jax.ShapeDtypeStruct((M, N), x.dtype),
        grid=(M // tm,),
        in_specs=[
            pl.BlockSpec((tm, K), lambda i: (i, 0)),
            pl.BlockSpec((K, N), lambda i: (0, 0)),
            pl.BlockSpec((1, N), lambda i: (0, 0)),
            pl.BlockSpec((tm, N), lambda i: (i, 0)),
            pl.BlockSpec((1, N), lambda i: (0, 0)),
            pl.BlockSpec((1, N), lambda i: (0, 0)),
        ],
        out_specs=pl.BlockSpec((tm, N), lambda i: (i, 0)),
        compiler_params=pltpu.CompilerParams(dimension_semantics=("parallel",)),
    )(x, w, b.reshape(1, N), residual, gamma.reshape(1, N), beta.reshape(1, N))


def multihead_attention(qkv3, key_bias, num_heads):
    """qkv3: [B, T, 3D] packed projections; key_bias: [B, 1, T] additive."""
    B, T, threeD = qkv3.shape
    D = threeD // 3
    hd = D // num_heads
    kernel = functools.partial(_attn_kernel, num_heads=num_heads,
                               scale=1.0 / math.sqrt(hd))
    return pl.pallas_call(
        kernel,
        out_shape=jax.ShapeDtypeStruct((B, T, D), qkv3.dtype),
        grid=(B,),
        in_specs=[
            pl.BlockSpec((1, T, threeD), lambda bi: (bi, 0, 0)),
            pl.BlockSpec((1, 1, T), lambda bi: (bi, 0, 0)),
        ],
        out_specs=pl.BlockSpec((1, T, D), lambda bi: (bi, 0, 0)),
        compiler_params=pltpu.CompilerParams(dimension_semantics=("parallel",)),
    )(qkv3, key_bias)


def mean_and_heads(h, mu_w, mu_b, sigma_w, sigma_b, frame_tile=None):
    """z = mean(h, axis=1); returns (z @ mu_w + mu_b, z @ sigma_w + sigma_b)."""
    B, T, D = h.shape
    if frame_tile is None:
        frame_tile = _frame_tile(T, B, D, jnp.dtype(h.dtype).itemsize)
    assert T % frame_tile == 0
    kernel = functools.partial(_mean_heads_kernel, inv_t=1.0 / T)
    mu, logvar = pl.pallas_call(
        kernel,
        out_shape=(jax.ShapeDtypeStruct((B, D), h.dtype),
                   jax.ShapeDtypeStruct((B, D), h.dtype)),
        grid=(T // frame_tile,),
        in_specs=[
            pl.BlockSpec((B, frame_tile, D), lambda i: (0, i, 0)),
            pl.BlockSpec((D, D), lambda i: (0, 0)),
            pl.BlockSpec((1, D), lambda i: (0, 0)),
            pl.BlockSpec((D, D), lambda i: (0, 0)),
            pl.BlockSpec((1, D), lambda i: (0, 0)),
        ],
        out_specs=[pl.BlockSpec((B, D), lambda i: (0, 0)),
                   pl.BlockSpec((B, D), lambda i: (0, 0))],
        scratch_shapes=[pltpu.VMEM((B, D), jnp.float32)],
        compiler_params=pltpu.CompilerParams(dimension_semantics=("arbitrary",)),
    )(h, mu_w, mu_b.reshape(1, D), sigma_w, sigma_b.reshape(1, D))
    return mu, logvar


# --------------------------------------------------------------------------- #
# Model: parameters, forward, pure-JAX reference                              #
# --------------------------------------------------------------------------- #
def make_positional_encoding(d_model, max_len=5000):
    position = jnp.arange(max_len, dtype=jnp.float32)[:, None]
    div_term = jnp.exp(jnp.arange(0, d_model, 2, dtype=jnp.float32)
                       * (-math.log(10000.0) / d_model))
    angles = position * div_term                       # [max_len, d_model//2]
    pe = jnp.stack([jnp.sin(angles), jnp.cos(angles)], axis=-1)
    return pe.reshape(max_len, d_model)                # even cols sin, odd cos


def init_params(key, input_feats, d_model, ff_size, num_layers):
    def dense(k, fan_in, fan_out):
        kw, kb = jax.random.split(k)
        lim = 1.0 / math.sqrt(fan_in)
        w = jax.random.uniform(kw, (fan_in, fan_out), jnp.float32, -lim, lim)
        b = jax.random.uniform(kb, (fan_out,), jnp.float32, -lim, lim)
        return w, b

    keys = jax.random.split(key, 3 + num_layers)
    params = {}
    params["skel_w"], params["skel_b"] = dense(keys[0], input_feats, d_model)
    params["mu_w"], params["mu_b"] = dense(keys[1], d_model, d_model)
    params["sigma_w"], params["sigma_b"] = dense(keys[2], d_model, d_model)
    params["pe"] = make_positional_encoding(d_model)
    layers = []
    for li in range(num_layers):
        lk = jax.random.split(keys[3 + li], 4)
        layer = {}
        layer["in_w"], layer["in_b"] = dense(lk[0], d_model, 3 * d_model)
        layer["out_w"], layer["out_b"] = dense(lk[1], d_model, d_model)
        layer["ff1_w"], layer["ff1_b"] = dense(lk[2], d_model, ff_size)
        layer["ff2_w"], layer["ff2_b"] = dense(lk[3], ff_size, d_model)
        layer["ln1_g"] = jnp.ones((d_model,), jnp.float32)
        layer["ln1_b"] = jnp.zeros((d_model,), jnp.float32)
        layer["ln2_g"] = jnp.ones((d_model,), jnp.float32)
        layer["ln2_b"] = jnp.zeros((d_model,), jnp.float32)
        layers.append(layer)
    params["layers"] = layers
    return params


def _encoder_layer(h, key_bias, p, num_heads):
    B, T, D = h.shape
    hf = h.reshape(B * T, D)
    qkv = linear(hf, p["in_w"], p["in_b"])                       # [B*T, 3D]
    attn = multihead_attention(qkv.reshape(B, T, 3 * D), key_bias, num_heads)
    h1 = linear_add_ln(attn.reshape(B * T, D), p["out_w"], p["out_b"],
                       hf, p["ln1_g"], p["ln1_b"])
    ffn = linear(h1, p["ff1_w"], p["ff1_b"], activation="gelu")
    h2 = linear_add_ln(ffn, p["ff2_w"], p["ff2_b"],
                       h1, p["ln2_g"], p["ln2_b"])
    return h2.reshape(B, T, D)


def encoder_transformer_forward(x, mask, params, num_heads):
    """x: [bs, njoints, nfeats, nframes]; mask: [bs, nframes] bool (True = valid)."""
    bs, njoints, nfeats, nframes = x.shape
    d_model = params["skel_w"].shape[1]
    # batch-major residual stream: [B, T, J*F]
    xt = jnp.transpose(x, (0, 3, 1, 2)).reshape(bs, nframes, njoints * nfeats)
    pe = params["pe"][:nframes][None].astype(x.dtype)            # [1, T, D]
    h = skel_embed_pe(xt, params["skel_w"], params["skel_b"], pe)  # [B, T, D]
    # TODO(synk): dropout (p=0.1) is identity here (eval mode).
    key_bias = jnp.where(mask, 0.0, _PAD_NEG).astype(jnp.float32)[:, None, :]
    for layer in params["layers"]:
        h = _encoder_layer(h, key_bias, layer, num_heads)
    mu, logvar = mean_and_heads(h, params["mu_w"], params["mu_b"],
                                params["sigma_w"], params["sigma_b"])
    return {"mu": mu, "logvar": logvar}


# ----------------------------- pure-JAX reference --------------------------- #
def _ref_linear(x, w, b, act=None):
    y = jnp.dot(x, w, precision=lax.Precision.HIGHEST) + b
    if act == "gelu":
        y = _gelu(y)
    return y


def _ref_layernorm(h, g, b, eps=1e-5):
    m = h.mean(-1, keepdims=True)
    v = jnp.mean(jnp.square(h - m), -1, keepdims=True)
    return (h - m) * lax.rsqrt(v + eps) * g + b


def reference_forward(x, mask, params, num_heads):
    bs, nj, nf, T = x.shape
    D = params["skel_w"].shape[1]
    H = num_heads
    hd = D // H
    xt = jnp.transpose(x, (3, 0, 1, 2)).reshape(T, bs, nj * nf)  # time-major
    h = _ref_linear(xt, params["skel_w"], params["skel_b"])
    h = h + params["pe"][:T][:, None, :]
    bias = jnp.where(mask, 0.0, _PAD_NEG).astype(jnp.float32)    # [B, T]
    for p in params["layers"]:
        hf = h.reshape(T * bs, D)
        qkv = _ref_linear(hf, p["in_w"], p["in_b"]).reshape(T, bs, 3, H, hd)
        q = jnp.transpose(qkv[:, :, 0], (1, 2, 0, 3))
        k = jnp.transpose(qkv[:, :, 1], (1, 2, 0, 3))
        v = jnp.transpose(qkv[:, :, 2], (1, 2, 0, 3))
        s = jnp.einsum("bhqd,bhkd->bhqk", q, k,
                       precision=lax.Precision.HIGHEST) / math.sqrt(hd)
        s = s + bias[:, None, None, :]
        pa = jax.nn.softmax(s, axis=-1)
        o = jnp.einsum("bhqk,bhkd->bhqd", pa, v, precision=lax.Precision.HIGHEST)
        o = jnp.transpose(o, (2, 0, 1, 3)).reshape(T * bs, D)
        o = _ref_linear(o, p["out_w"], p["out_b"])
        h1 = _ref_layernorm(hf + o, p["ln1_g"], p["ln1_b"])
        f = _ref_linear(h1, p["ff1_w"], p["ff1_b"], act="gelu")
        f = _ref_linear(f, p["ff2_w"], p["ff2_b"])
        h = _ref_layernorm(h1 + f, p["ln2_g"], p["ln2_b"]).reshape(T, bs, D)
    z = h.mean(axis=0)
    mu = _ref_linear(z, params["mu_w"], params["mu_b"])
    logvar = _ref_linear(z, params["sigma_w"], params["sigma_b"])
    return mu, logvar


# --------------------------------------------------------------------------- #
if __name__ == "__main__":
    bs, njoints, nfeats, nframes = 2, 4, 3, 8
    d_model, ff_size, num_layers, num_heads = 128, 256, 2, 4

    key = jax.random.PRNGKey(0)
    kx, kp = jax.random.split(key)
    x = jax.random.normal(kx, (bs, njoints, nfeats, nframes), jnp.float32)
    lengths = jnp.array([8, 5], jnp.int32)
    mask = jnp.arange(nframes)[None, :] < lengths[:, None]   # [bs, T] bool

    params = init_params(kp, njoints * nfeats, d_model, ff_size, num_layers)

    out = encoder_transformer_forward(x, mask, params, num_heads)
    mu, logvar = out["mu"], out["logvar"]
    jax.block_until_ready((mu, logvar))

    assert mu.shape == (bs, d_model) and logvar.shape == (bs, d_model)

    ref_mu, ref_logvar = reference_forward(x, mask, params, num_heads)
    assert jnp.allclose(mu, ref_mu, atol=2e-3, rtol=2e-3), "mu mismatch vs reference"
    assert jnp.allclose(logvar, ref_logvar, atol=2e-3, rtol=2e-3), "logvar mismatch vs reference"

    print("KERNEL_OK")
</pallas_src>

<mosaic_0001>
module attributes {stable_mosaic.version = 11 : i64} {
  func.func @_skel_pe_kernel(%arg0: i32, %arg1: memref<1x8x12xf32, #tpu.memory_space<vmem>>, %arg2: memref<12x128xf32, #tpu.memory_space<vmem>>, %arg3: memref<1x128xf32, #tpu.memory_space<vmem>>, %arg4: memref<1x8x128xf32, #tpu.memory_space<vmem>>, %arg5: memref<1x8x128xf32, #tpu.memory_space<vmem>>) attributes {dimension_semantics = [#tpu.dimension_semantics<parallel>], iteration_bounds = array<i64: 2>, scalar_prefetch = 0 : i64, scratch_operands = 0 : i64, tpu.core_type = #tpu.core_type<tc>, window_params = [{transform_indices = @transform_0, window_bounds = array<i64: 1, 8, 12>}, {pipeline_mode = #tpu.pipeline_mode<synchronous>, transform_indices = @transform_1, window_bounds = array<i64: 12, 128>}, {pipeline_mode = #tpu.pipeline_mode<synchronous>, transform_indices = @transform_2, window_bounds = array<i64: 1, 128>}, {pipeline_mode = #tpu.pipeline_mode<synchronous>, transform_indices = @transform_3, window_bounds = array<i64: 1, 8, 128>}, {transform_indices = @transform_4, window_bounds = array<i64: 1, 8, 128>}]} {
    %c0 = arith.constant 0 : index
    %c0_0 = arith.constant 0 : index
    %c0_1 = arith.constant 0 : index
    %0 = vector.load %arg1[%c0, %c0_0, %c0_1] : memref<1x8x12xf32, #tpu.memory_space<vmem>>, vector<1x8x12xf32>
    %1 = vector.shape_cast %0 : vector<1x8x12xf32> to vector<8x12xf32>
    %c0_2 = arith.constant 0 : index
    %c0_3 = arith.constant 0 : index
    %2 = vector.load %arg2[%c0_2, %c0_3] : memref<12x128xf32, #tpu.memory_space<vmem>>, vector<12x128xf32>
    %cst = arith.constant dense<0.000000e+00> : vector<8x128xf32>
    %3 = tpu.matmul %1, %2, %cst {dimension_numbers = #tpu.dot_dimension_numbers<[1], [0], [0], [1], [0, 0, 1, 1], [], []>} : vector<8x12xf32>, vector<12x128xf32>, vector<8x128xf32> -> vector<8x128xf32>
    %c0_4 = arith.constant 0 : index
    %c0_5 = arith.constant 0 : index
    %4 = vector.load %arg3[%c0_4, %c0_5] : memref<1x128xf32, #tpu.memory_space<vmem>>, vector<1x128xf32>
    %5 = vector.broadcast %4 : vector<1x128xf32> to vector<8x128xf32>
    %6 = arith.addf %3, %5 : vector<8x128xf32>
    %c0_6 = arith.constant 0 : index
    %c0_7 = arith.constant 0 : index
    %c0_8 = arith.constant 0 : index
    %7 = vector.load %arg4[%c0_6, %c0_7, %c0_8] : memref<1x8x128xf32, #tpu.memory_space<vmem>>, vector<1x8x128xf32>
    %8 = vector.shape_cast %7 : vector<1x8x128xf32> to vector<8x128xf32>
    %9 = arith.addf %6, %8 : vector<8x128xf32>
    %c0_9 = arith.constant 0 : index
    %c0_10 = arith.constant 0 : index
    %c0_11 = arith.constant 0 : index
    %10 = vector.load %arg5[%c0_9, %c0_10, %c0_11] : memref<1x8x128xf32, #tpu.memory_space<vmem>>, vector<1x8x128xf32>
    %11 = vector.shape_cast %10 : vector<1x8x128xf32> to vector<8x128xf32>
    %12 = vector.shape_cast %9 : vector<8x128xf32> to vector<1x8x128xf32>
    tpu.vector_store %arg5[%c0_9, %c0_10, %c0_11], %12 {strides = array<i32>} : memref<1x8x128xf32, #tpu.memory_space<vmem>>, vector<1x8x128xf32>,
    return
  }
  func.func @transform_0(%arg0: i32) -> (i32, i32, i32) {
    %c0_i32 = arith.constant 0 : i32
    %c0_i32_0 = arith.constant 0 : i32
    %c0_i32_1 = arith.constant 0 : i32
    return %arg0, %c0_i32, %c0_i32_0 : i32, i32, i32
  }
  func.func @transform_1(%arg0: i32) -> (i32, i32) {
    %c0_i32 = arith.constant 0 : i32
    %c0_i32_0 = arith.constant 0 : i32
    %c0_i32_1 = arith.constant 0 : i32
    return %c0_i32, %c0_i32_0 : i32, i32
  }
  func.func @transform_2(%arg0: i32) -> (i32, i32) {
    %c0_i32 = arith.constant 0 : i32
    %c0_i32_0 = arith.constant 0 : i32
    %c0_i32_1 = arith.constant 0 : i32
    return %c0_i32, %c0_i32_0 : i32, i32
  }
  func.func @transform_3(%arg0: i32) -> (i32, i32, i32) {
    %c0_i32 = arith.constant 0 : i32
    %c0_i32_0 = arith.constant 0 : i32
    %c0_i32_1 = arith.constant 0 : i32
    %c0_i32_2 = arith.constant 0 : i32
    return %c0_i32, %c0_i32_0, %c0_i32_1 : i32, i32, i32
  }
  func.func @transform_4(%arg0: i32) -> (i32, i32, i32) {
    %c0_i32 = arith.constant 0 : i32
    %c0_i32_0 = arith.constant 0 : i32
    %c0_i32_1 = arith.constant 0 : i32
    return %arg0, %c0_i32, %c0_i32_0 : i32, i32, i32
  }
}

</mosaic_0001>

<bundles_post_ra>
// kernel: tpu_custom_call.1
= control target key start
LH: loop header
LB: loop body
LE: loop exit
PB: predicated region body
PF: predicated region fallthrough
CT: control target
= control target key end

     0   :  { %9 = vsyncpa [#allocation3], 0  ;;  %s816_s0 = inlined_call_operand.hbm [shape: f32[2,8,12], index: 0, kind: input, shape index: {}]   ;;  %s817_s1 = inlined_call_operand.hbm [shape: f32[12,128], index: 1, kind: input, shape index: {}]   ;;  %s818_s2 = inlined_call_operand.vmem [shape: f32[1,128], index: 2, kind: input, shape index: {}]   ;;  %s819_s3 = inlined_call_operand.hbm [shape: f32[1,8,128], index: 3, kind: input, shape index: {}]   ;;  %s820_s4 = inlined_call_operand.hbm [shape: f32[2,8,128], index: 4, kind: output, shape index: {}]  }
   0x1   :  { %11 = vsyncpa [#allocation3 + $0x1], 0 }
   0x2   :  { %12 = vsyncpa [#allocation6], 0 }
   0x3   :  { %13 = vsyncpa [#allocation4], 0 }
   0x4   :  { %15 = vsyncpa [#allocation4 + $0x1], 0  ;;  %s668_s15 = smov 0   ;;  %s670_s16 = smov 0  }
   0x5   :  { %s672_s17 = smov 0   ;;  %s674_s18 = smov 0  }
   0x6 LB: > { %s152_s21 = sshll.u32 %s817_s1, 4  ;;  %s692_s22 = sadd.s32 4294967295, %s637_s18   ;;  %s637_s18 = sphi %s674_s18, %s831_s18   ;;  %s633_s17 = sphi %s672_s17, %s830_s17   ;;  %s629_s16 = sphi %s670_s16, %s829_s16   ;;  %s625_s15 = sphi %s668_s15, %s828_s15   ;;  %s153_s21 = int_to_ptr.hbm [resolvable:$true] %s152_s21 }
   0x7   : > { %p390_p0 = scmp.ge.s32.totalorder %s637_s18, 1  ;;  %p42_p1 = scmp.eq.s32.totalorder %s692_s22, 0 }
   0x8   : > { %p141_p2 = scmp.lt.s32.totalorder %s637_s18, 3  ;;  %s639_s24 = smov [#allocation5]  }
   0x9   : > { %s154_s25 = sshll.u32 %s639_s24, 4  ;;  %s170_s28 = sshll.u32 %s819_s3, 4  ;;  %s155_s25 = int_to_ptr.vmem [resolvable:$true] %s154_s25  ;;  %s171_s28 = int_to_ptr.hbm [resolvable:$true] %s170_s28 }
   0xa   : > { %p697_p3 = pnand %p390_p0, %p141_p2  ;;  %s640_s29 = smov [#allocation7]  }
   0xb   : > { %s172_s30 = sshll.u32 %s640_s29, 4  ;;  %s641_s5 = smov 128   ;;  %s173_s30 = int_to_ptr.vmem [resolvable:$true] %s172_s30 }
   0xc   : > { %p419_p4 = pneg %p697_p3  ;;  %s642_s6 = smov 8  }
   0xd   : > { %s389_s7 = sadd.s32 4294967294, %s637_s18   ;;  %s711_s8 = sadd.s32 1, %s637_s18  }
   0xe   : > { %p420_p6 = pnand %p419_p4, %p42_p1  ;;  %s25_s9 = ssub.s32 %s637_s18, %s711_s8 }
   0xf   : > { %s28_s10 = sadd.s32 1, %s633_s17  ;;  %p26_p7 = scmp.eq.s32.totalorder %s25_s9, 0 }
  0x10   : > { %422 = dma.hbm_to_vmem [thread:$0]  (!%p420_p6), %s153_s21, 256, %s155_s25, [#allocation6], %s641_s5, %s641_s5, %s642_s6  }
  0x11   : > { %425 = dma.hbm_to_vmem [thread:$0]  (!%p420_p6), %s171_s28, 128, %s173_s30, [#allocation6]  }
  0x12   : > { %p35_p8 = scmp.ne.s32.totalorder %s633_s17, %s629_s16  ;;  %p36_p9 = scmp.eq.s32.totalorder %s637_s18, 0 }
  0x13   : > { %p41_p10 = scmp.ne.s32.totalorder %s629_s16, %s625_s15  ;;  %p128_p13 = scmp.eq.s32.totalorder %s692_s22, 1 }
  0x14   : > { %s722_s11 = scalar_select %p26_p7, %s633_s17, %s28_s10  }
  0x15   : > { %p724_p11 = por %p36_p9, %p35_p8  ;;  %p730_p12 = por %p42_p1, %p41_p10 }
  0x16   : > { %p134_p0 = scmp.eq.s32.totalorder %s389_s7, 1  ;;  %p436_p2 = scmp.lt.s32.totalorder %s637_s18, 2 }
  0x17   : > { %s183_s14 = sand.u32 1, %s633_s17   ;;  %p737_p4 = por %p128_p13, %p35_p8 }
  0x18   : > { %p741_p6 = por %p134_p0, %p41_p10  ;;  %s394_s21 = sshll.u32 %s183_s14, 3 }
  0x19   : > { %s395_s24 = sshll.u32 %s637_s18, 3  ;;  %s187_s28 = scalar_lea.vmem [#allocation2], %s394_s21 }
  0x1a   : > { %s191_s27 = scalar_lea.hbm %s816_s0, %s395_s24  ;;  %s195_s29 = sshll.u32 %s187_s28, 4  ;;  %s196_s29 = int_to_ptr.vmem [resolvable:$true] %s195_s29 }
  0x1b   : > { %s193_s30 = sshll.u32 %s191_s27, 4  ;;  %p751_p7 = pnand %p436_p2, %p724_p11  ;;  %s194_s30 = int_to_ptr.hbm [resolvable:$true] %s193_s30 }
  0x1c   : > { %s184_s6 = scalar_lea.sflag [#allocation3], %s183_s14  ;;  %s537_s7 = sshra.s32 %s194_s30, 4  ;;  %s538_s7 = int_to_ptr.hbm [resolvable:$true] %s537_s7 }
  0x1d   : > { %s539_s9 = scalar_lea.hbm %s538_s7, 8  ;;  %p541_p9 = pneg %p751_p7 }
  0x1e   : > { %p540_p8 = scmp.ne.s32.totalorder %s538_s7, %s539_s9  ;;  %s544_s24 = scalar_lea.hbm %s816_s0, 16 }
  0x1f   : > { %p545_p11 = scmp.lt.s32.totalorder %s538_s7, %s816_s0  ;;  %p546_p0 = scmp.lt.s32.totalorder %s544_s24, %s539_s9 }
  0x20   : > { %p542_p10 = pnand %p541_p9, %p540_p8 }
  0x21   : > { %p547_p2 = por %p546_p0, %p545_p11 }
  0x22   : > { %p543_p13 = pneg %p542_p10 }
  0x24   : > { %p548_p5 = pnand %p547_p2, %p543_p13 }
  0x26   : > { %551 = shalt.err (!%p548_p5)
}
  0x27   : > { %429 = dma.hbm_to_vmem [thread:$0]  (!%p751_p7), %s194_s30, 128, %s196_s29, %s184_s6  }
  0x28   : > { %204 = sbr.rel (%p697_p3) target bundleno = 185 (0xb9), region = 36  ;;  %s768_s14 = sand.u32 (!%p697_p3), 1, %s629_s16  }
  0x29   : > { %s397_s26 = sshll.u32 (!%p697_p3), %s768_s14, 3  ;;  %s207_s27 = scalar_lea.sflag (!%p697_p3), [#allocation3], %s768_s14 }
  0x2a   : > { %s210_s28 = scalar_lea.vmem (!%p697_p3), [#allocation2], %s397_s26 }
  0x2d   : > { %612 = dma.done.wait (%p730_p12), %s207_s27, 128  }
  0x2e   : > { %614 = vsyncadd (%p730_p12), %s207_s27, 4294967168 }
  0x2f   : > { %616 = dma.done.wait (%p42_p1), [#allocation6], 384  }
  0x30   : > { %618 = vsyncadd (%p42_p1), [#allocation6], 4294966912  ;;  %vm257_vm0 = vcmask 1043456   ;;  %v248_v0 = vld [vmem:[#allocation5 + $0x8] sm:$0xf]  ;;  %v247_v1 = vld [vmem:[#allocation5] sm:$0xff] }
  0x31   : > { %401 = vmatpush.msk.msra.mxu0 %vm257_vm0, %v248_v0  ;;  %v246_v2 = vld [vmem:[%s210_s28] sm:$0xff]  ;;  %vm253_vm1 = vcmask 97280   ;;  %s404_s23 = sshll.u32 %s692_s22, 3  ;;  %s245_s7 = scalar_lea.vmem [#allocation8], %s397_s26 }
  0x32   : > { %v476_v3 = vld [vmem:[%s818_s2] ss:$0 sm:$0xff]  ;;  %s295_s6 = scalar_lea.hbm %s820_s4, %s404_s23  ;;  %s297_s9 = sshll.u32 %s245_s7, 4  ;;  %s298_s9 = int_to_ptr.vmem [resolvable:$true] %s297_s9 }
  0x33   : > { %276 = vmatpush.msra.mxu0 %v247_v1  ;;  %v281_v5 = vld [vmem:[#allocation7] sm:$0xff]  ;;  %s299_s10 = sshll.u32 %s295_s6, 4  ;;  %s285_s22 = scalar_lea.sflag [#allocation4], %s768_s14  ;;  %s300_s10 = int_to_ptr.hbm [resolvable:$true] %s299_s10 }
  0x34   : > { %402 = vmatmul.msk.f32.vlgmr.msra.gmra.mxu0 %vm253_vm1, %v246_v2  ;;  %s581_s21 = sshra.s32 %s300_s10, 4  ;;  %s587_s27 = scalar_lea.hbm %s820_s4, 16  ;;  %s582_s21 = int_to_ptr.hbm [resolvable:$true] %s581_s21 }
  0x35   : > { %s583_s24 = scalar_lea.hbm %s582_s21, 8  ;;  %p588_p12 = scmp.lt.s32.totalorder %s582_s21, %s820_s4 }
  0x36   : > { %p584_p1 = scmp.ne.s32.totalorder %s582_s21, %s583_s24  ;;  %p589_p7 = scmp.lt.s32.totalorder %s587_s27, %s583_s24 }
  0x38   : > { %p585_p3 = pnand %p584_p1, %p737_p4  ;;  %p590_p8 = por %p589_p7, %p588_p12 }
  0x3a   : > { %p586_p5 = pneg %p585_p3 }
  0x3c   : > { %p591_p9 = pnand %p590_p8, %p586_p5 }
  0xb1   : > { %v278_v4 = vpop.f32.mrf.mxu0 }
  0xb2   : > { %v279_v6 = vadd.f32 %v476_v3, %v278_v4 }
  0xb4   : > { %v282_v7 = vadd.f32 %v281_v5, %v279_v6 }
  0xb6   : > { %283 = vst [vmem:[%s245_s7] sm:$0xff] %v282_v7 }
  0xb7   : > { %594 = shalt.err (!%p591_p9)
}
  0xb8   : > { %417 = dma.vmem_to_hbm [thread:$0]  (%p737_p4), %s298_s9, 128, %s300_s10, %s285_s22  }
  0xb9 PF: > { %s311_s14 = sand.u32 1, %s625_s15   ;;  %p827_p10 = scmp.ge.s32.totalorder %s637_s18, 2 }
  0xba   : > { %s312_s23 = scalar_lea.sflag [#allocation4], %s311_s14 }
  0xbb   : > { %p431_p13 = pnand %p827_p10, %p741_p6 }
  0xbd   : > { %p432_p11 = pneg %p431_p13 }
  0xbf   : > { %620 = dma.done.wait (%p432_p11), %s312_s23, 128  }
  0xc0   : > { %622 = vsyncadd (%p432_p11), %s312_s23, 4294967168  ;;  %p18_p0 = scmp.ge.s32.totalorder %s711_s8, 4   ;;  %s828_s15 = smov %s629_s16 }
  0xc1   : > { %s829_s16 = smov %s633_s17  ;;  %s830_s17 = smov %s722_s11 }
  0xc2   : > { %s831_s18 = smov %s711_s8  ;;  %20 = sbr.rel (!%p18_p0) target bundleno = 6 (0x6), region = 89 }
  0xc7   :  { %318 = vsyncpa [#allocation3], 1 }
  0xc8   :  { %320 = vsyncpa [#allocation3 + $0x1], 1 }
  0xc9   :  { %321 = vsyncpa [#allocation6], 1 }
  0xca   :  { %322 = vsyncpa [#allocation4], 1 }
  0xcb   :  { %324 = vsyncpa [#allocation4 + $0x1], 1 }

</bundles_post_ra>
